<compile_context>
chip_gen: v7x
topology: tpu7x:2x2x1
jax: 0.10.0
libtpu: 0.0.40
codegen_flags: <defaults>
</compile_context>

<pallas_src>
import functools

import jax
import jax.numpy as jnp
from jax import lax
from jax.experimental import pallas as pl
from jax.experimental.pallas import tpu as pltpu


def _mhsa_kernel(x_ref, wq_ref, wk_ref, wv_ref, bq_ref, bk_ref, bv_ref,
                 wo_ref, bo_ref, g_ref, beta_ref, o_ref, acc_ref, *,
                 num_heads: int, head_dim: int, eps: float):
    h = pl.program_id(1)
    BB, S, E = x_ref.shape

    x = x_ref[...]                           # (BB, S, E), native dtype
    x2 = x.reshape(BB * S, E)                # batch-fused rows for the projections

    scale = 1.0 / (head_dim ** 0.5)

    # Per-head in-projections. The head's (E, Dh) weight slab is delivered by the
    # BlockSpec (rectangular DMA), so no in-kernel Dh-wide lane slicing is needed.
    q = jnp.dot(x2, wq_ref[0], preferred_element_type=jnp.float32) + bq_ref[0]
    k = jnp.dot(x2, wk_ref[0], preferred_element_type=jnp.float32) + bk_ref[0]
    v = jnp.dot(x2, wv_ref[0], preferred_element_type=jnp.float32) + bv_ref[0]
    q = (q * scale).astype(x.dtype).reshape(BB, S, head_dim)
    k = k.astype(x.dtype).reshape(BB, S, head_dim)
    v = v.astype(x.dtype).reshape(BB, S, head_dim)

    # Batched scaled-dot-product attention over the BB batch elements of this tile.
    scores = jnp.einsum('bqd,bkd->bqk', q, k,
                        preferred_element_type=jnp.float32)         # (BB, S, S)
    scores = scores - jnp.max(scores, axis=-1, keepdims=True)
    p = jnp.exp(scores)
    p = p * pl.reciprocal(jnp.sum(p, axis=-1, keepdims=True), approx=True)
    o_h = jnp.einsum('bqk,bkd->bqd', p.astype(x.dtype), v,
                     preferred_element_type=jnp.float32)             # (BB, S, Dh)
    o_h = o_h.reshape(BB * S, head_dim)

    @pl.when(h == 0)
    def _():
        # Residual + out-projection bias, accumulated once per batch tile.
        acc_ref[...] = x2.astype(jnp.float32) + bo_ref[...].astype(jnp.float32)

    # Out-projection as a sum over heads: concat(heads) @ Wout^T == sum_h head_h @ Wout_h^T
    acc_ref[...] += jnp.dot(o_h.astype(x.dtype), wo_ref[0],
                            preferred_element_type=jnp.float32)

    @pl.when(h == num_heads - 1)
    def _():
        # Dropout = identity in eval.  TODO(synk): training-mode dropout (RNG mask) not implemented.
        y = acc_ref[...]                                             # (BB*S, E) f32
        mean = jnp.mean(y, axis=-1, keepdims=True)
        var = jnp.mean((y - mean) ** 2, axis=-1, keepdims=True)
        y_n = (y - mean) * lax.rsqrt(var + eps)
        out = y_n * g_ref[...].astype(jnp.float32) + beta_ref[...].astype(jnp.float32)
        o_ref[...] = out.reshape(BB, S, E).astype(o_ref.dtype)


def _pick_batch_tile(batch: int, seq: int, row_target: int = 256) -> int:
    """Largest divisor of `batch` whose tile gives ~row_target fused rows."""
    cap = max(1, row_target // max(seq, 1))
    best = 1
    for d in range(1, batch + 1):
        if batch % d == 0 and d <= cap:
            best = d
    return best


def mhsa_block(x, w_in, b_in, w_out, b_out, gamma, beta, *, num_heads: int,
               eps: float = 1e-5):
    """x: (B, S, E); w_in: (3E, E); b_in: (3E,); w_out: (E, E); b_out, gamma, beta: (E,)."""
    B, S, E = x.shape
    assert E % num_heads == 0
    Dh = E // num_heads
    BB = _pick_batch_tile(B, S)

    # --- wrapper-side layout plumbing (plain XLA, done once) ---
    w_q, w_k, w_v = w_in[:E], w_in[E:2 * E], w_in[2 * E:]
    # Head-major transposed projection weights: (H, E, Dh).
    wq_h = jnp.transpose(w_q.reshape(num_heads, Dh, E), (0, 2, 1))
    wk_h = jnp.transpose(w_k.reshape(num_heads, Dh, E), (0, 2, 1))
    wv_h = jnp.transpose(w_v.reshape(num_heads, Dh, E), (0, 2, 1))
    bq_h = b_in[:E].reshape(num_heads, 1, Dh)
    bk_h = b_in[E:2 * E].reshape(num_heads, 1, Dh)
    bv_h = b_in[2 * E:].reshape(num_heads, 1, Dh)
    # Head-major rows of W_out^T: (H, Dh, E).
    wo_h = jnp.transpose(w_out).reshape(num_heads, Dh, E)
    bo2 = b_out.reshape(1, E)
    g2 = gamma.reshape(1, E)
    beta2 = beta.reshape(1, E)

    kernel = functools.partial(_mhsa_kernel, num_heads=num_heads,
                               head_dim=Dh, eps=eps)

    def head_spec(shape):
        return pl.BlockSpec(shape, lambda b, h: (h, 0, 0))

    def const_spec(shape):
        return pl.BlockSpec(shape, lambda b, h: (0, 0))

    grid = (B // BB, num_heads)
    return pl.pallas_call(
        kernel,
        out_shape=jax.ShapeDtypeStruct((B, S, E), x.dtype),
        grid_spec=pltpu.PrefetchScalarGridSpec(
            num_scalar_prefetch=0,
            grid=grid,
            in_specs=[
                pl.BlockSpec((BB, S, E), lambda b, h: (b, 0, 0)),  # x (resident across heads)
                head_spec((1, E, Dh)),                             # Wq_h^T
                head_spec((1, E, Dh)),                             # Wk_h^T
                head_spec((1, E, Dh)),                             # Wv_h^T
                head_spec((1, 1, Dh)),                             # bq_h
                head_spec((1, 1, Dh)),                             # bk_h
                head_spec((1, 1, Dh)),                             # bv_h
                head_spec((1, Dh, E)),                             # Wout_h^T
                const_spec((1, E)),                                # b_out
                const_spec((1, E)),                                # gamma
                const_spec((1, E)),                                # beta
            ],
            out_specs=pl.BlockSpec((BB, S, E), lambda b, h: (b, 0, 0)),
            scratch_shapes=[pltpu.VMEM((BB * S, E), jnp.float32)],
        ),
        compiler_params=pltpu.CompilerParams(
            dimension_semantics=("parallel", "arbitrary"),
            vmem_limit_bytes=64 * 1024 * 1024,
        ),
    )(x, wq_h, wk_h, wv_h, bq_h, bk_h, bv_h, wo_h, bo2, g2, beta2)


def reference_mhsa(x, w_in, b_in, w_out, b_out, gamma, beta, *, num_heads, eps=1e-5):
    """Pure-JAX reference matching nn.MultiheadAttention + residual + LayerNorm (eval)."""
    B, S, E = x.shape
    Dh = E // num_heads
    qkv = jnp.einsum('bse,fe->bsf', x, w_in) + b_in          # (B, S, 3E)
    q, k, v = jnp.split(qkv, 3, axis=-1)

    def heads(t):
        return t.reshape(B, S, num_heads, Dh).transpose(0, 2, 1, 3)  # (B, H, S, Dh)

    q, k, v = heads(q), heads(k), heads(v)
    scores = jnp.einsum('bhqd,bhkd->bhqk', q, k) / jnp.sqrt(Dh).astype(x.dtype)
    p = jax.nn.softmax(scores, axis=-1)
    o = jnp.einsum('bhqk,bhkd->bhqd', p, v).transpose(0, 2, 1, 3).reshape(B, S, E)
    attn_out = jnp.einsum('bse,fe->bsf', o, w_out) + b_out
    y = x + attn_out
    mean = jnp.mean(y, axis=-1, keepdims=True)
    var = jnp.mean((y - mean) ** 2, axis=-1, keepdims=True)
    return (y - mean) / jnp.sqrt(var + eps) * gamma + beta


if __name__ == "__main__":
    B, S, E, H = 2, 8, 32, 4

    key = jax.random.PRNGKey(0)
    k_x, k_win, k_wout, k_bin, k_bout, k_g, k_b = jax.random.split(key, 7)

    x = jax.random.normal(k_x, (B, S, E), dtype=jnp.float32)

    # Deterministic parameter init (shapes follow nn.MultiheadAttention / nn.LayerNorm).
    w_in = jax.random.normal(k_win, (3 * E, E), dtype=jnp.float32) * 0.05    # in_proj_weight
    b_in = jax.random.normal(k_bin, (3 * E,), dtype=jnp.float32) * 0.02      # in_proj_bias
    w_out = jax.random.normal(k_wout, (E, E), dtype=jnp.float32) * 0.05      # out_proj.weight
    b_out = jax.random.normal(k_bout, (E,), dtype=jnp.float32) * 0.02        # out_proj.bias
    gamma = 1.0 + 0.1 * jax.random.normal(k_g, (E,), dtype=jnp.float32)      # LayerNorm weight
    beta = 0.05 * jax.random.normal(k_b, (E,), dtype=jnp.float32)            # LayerNorm bias

    out = mhsa_block(x, w_in, b_in, w_out, b_out, gamma, beta, num_heads=H)
    out = jax.block_until_ready(out)

    ref = reference_mhsa(x, w_in, b_in, w_out, b_out, gamma, beta, num_heads=H)
    assert out.shape == (B, S, E)
    # Tolerance slightly loosened for the approximate (EUP) softmax reciprocal.
    assert jnp.allclose(out, ref, atol=3e-3, rtol=3e-3), "mismatch vs reference"

    print("KERNEL_OK")
</pallas_src>

<mosaic_0001>
module attributes {stable_mosaic.version = 11 : i64} {
  func.func @_mhsa_kernel(%arg0: i32, %arg1: i32, %arg2: memref<2x8x32xf32, #tpu.memory_space<vmem>>, %arg3: memref<1x32x8xf32, #tpu.memory_space<vmem>>, %arg4: memref<1x32x8xf32, #tpu.memory_space<vmem>>, %arg5: memref<1x32x8xf32, #tpu.memory_space<vmem>>, %arg6: memref<1x1x8xf32, #tpu.memory_space<vmem>>, %arg7: memref<1x1x8xf32, #tpu.memory_space<vmem>>, %arg8: memref<1x1x8xf32, #tpu.memory_space<vmem>>, %arg9: memref<1x8x32xf32, #tpu.memory_space<vmem>>, %arg10: memref<1x32xf32, #tpu.memory_space<vmem>>, %arg11: memref<1x32xf32, #tpu.memory_space<vmem>>, %arg12: memref<1x32xf32, #tpu.memory_space<vmem>>, %arg13: memref<2x8x32xf32, #tpu.memory_space<vmem>>, %arg14: memref<16x32xf32, #tpu.memory_space<vmem>>) attributes {dimension_semantics = [#tpu.dimension_semantics<parallel>, #tpu.dimension_semantics<arbitrary>], iteration_bounds = array<i64: 1, 4>, scalar_prefetch = 0 : i64, scratch_operands = 1 : i64, tpu.core_type = #tpu.core_type<tc>, window_params = [{transform_indices = @transform_0, window_bounds = array<i64: 2, 8, 32>}, {transform_indices = @transform_1, window_bounds = array<i64: 1, 32, 8>}, {transform_indices = @transform_2, window_bounds = array<i64: 1, 32, 8>}, {transform_indices = @transform_3, window_bounds = array<i64: 1, 32, 8>}, {transform_indices = @transform_4, window_bounds = array<i64: 1, 1, 8>}, {transform_indices = @transform_5, window_bounds = array<i64: 1, 1, 8>}, {transform_indices = @transform_6, window_bounds = array<i64: 1, 1, 8>}, {transform_indices = @transform_7, window_bounds = array<i64: 1, 8, 32>}, {pipeline_mode = #tpu.pipeline_mode<synchronous>, transform_indices = @transform_8, window_bounds = array<i64: 1, 32>}, {pipeline_mode = #tpu.pipeline_mode<synchronous>, transform_indices = @transform_9, window_bounds = array<i64: 1, 32>}, {pipeline_mode = #tpu.pipeline_mode<synchronous>, transform_indices = @transform_10, window_bounds = array<i64: 1, 32>}, {transform_indices = @transform_11, window_bounds = array<i64: 2, 8, 32>}]} {
    %c0 = arith.constant 0 : index
    %c0_0 = arith.constant 0 : index
    %c0_1 = arith.constant 0 : index
    %0 = vector.load %arg2[%c0, %c0_0, %c0_1] : memref<2x8x32xf32, #tpu.memory_space<vmem>>, vector<2x8x32xf32>
    %1 = vector.shape_cast %0 : vector<2x8x32xf32> to vector<16x32xf32>
    %c0_2 = arith.constant 0 : index
    %c0_3 = arith.constant 0 : index
    %c0_4 = arith.constant 0 : index
    %2 = vector.load %arg3[%c0_2, %c0_3, %c0_4] : memref<1x32x8xf32, #tpu.memory_space<vmem>>, vector<1x32x8xf32>
    %3 = vector.shape_cast %2 : vector<1x32x8xf32> to vector<32x8xf32>
    %cst = arith.constant dense<0.000000e+00> : vector<16x8xf32>
    %4 = tpu.matmul %1, %3, %cst {dimension_numbers = #tpu.dot_dimension_numbers<[1], [0], [0], [1], [0, 0, 1, 1], [], []>} : vector<16x32xf32>, vector<32x8xf32>, vector<16x8xf32> -> vector<16x8xf32>
    %c0_5 = arith.constant 0 : index
    %c0_6 = arith.constant 0 : index
    %c0_7 = arith.constant 0 : index
    %5 = vector.load %arg6[%c0_5, %c0_6, %c0_7] : memref<1x1x8xf32, #tpu.memory_space<vmem>>, vector<1x1x8xf32>
    %6 = vector.shape_cast %5 : vector<1x1x8xf32> to vector<1x8xf32>
    %7 = vector.broadcast %6 : vector<1x8xf32> to vector<16x8xf32>
    %8 = arith.addf %4, %7 : vector<16x8xf32>
    %c0_8 = arith.constant 0 : index
    %c0_9 = arith.constant 0 : index
    %c0_10 = arith.constant 0 : index
    %9 = vector.load %arg4[%c0_8, %c0_9, %c0_10] : memref<1x32x8xf32, #tpu.memory_space<vmem>>, vector<1x32x8xf32>
    %10 = vector.shape_cast %9 : vector<1x32x8xf32> to vector<32x8xf32>
    %cst_11 = arith.constant dense<0.000000e+00> : vector<16x8xf32>
    %11 = tpu.matmul %1, %10, %cst_11 {dimension_numbers = #tpu.dot_dimension_numbers<[1], [0], [0], [1], [0, 0, 1, 1], [], []>} : vector<16x32xf32>, vector<32x8xf32>, vector<16x8xf32> -> vector<16x8xf32>
    %c0_12 = arith.constant 0 : index
    %c0_13 = arith.constant 0 : index
    %c0_14 = arith.constant 0 : index
    %12 = vector.load %arg7[%c0_12, %c0_13, %c0_14] : memref<1x1x8xf32, #tpu.memory_space<vmem>>, vector<1x1x8xf32>
    %13 = vector.shape_cast %12 : vector<1x1x8xf32> to vector<1x8xf32>
    %14 = vector.broadcast %13 : vector<1x8xf32> to vector<16x8xf32>
    %15 = arith.addf %11, %14 : vector<16x8xf32>
    %c0_15 = arith.constant 0 : index
    %c0_16 = arith.constant 0 : index
    %c0_17 = arith.constant 0 : index
    %16 = vector.load %arg5[%c0_15, %c0_16, %c0_17] : memref<1x32x8xf32, #tpu.memory_space<vmem>>, vector<1x32x8xf32>
    %17 = vector.shape_cast %16 : vector<1x32x8xf32> to vector<32x8xf32>
    %cst_18 = arith.constant dense<0.000000e+00> : vector<16x8xf32>
    %18 = tpu.matmul %1, %17, %cst_18 {dimension_numbers = #tpu.dot_dimension_numbers<[1], [0], [0], [1], [0, 0, 1, 1], [], []>} : vector<16x32xf32>, vector<32x8xf32>, vector<16x8xf32> -> vector<16x8xf32>
    %c0_19 = arith.constant 0 : index
    %c0_20 = arith.constant 0 : index
    %c0_21 = arith.constant 0 : index
    %19 = vector.load %arg8[%c0_19, %c0_20, %c0_21] : memref<1x1x8xf32, #tpu.memory_space<vmem>>, vector<1x1x8xf32>
    %20 = vector.shape_cast %19 : vector<1x1x8xf32> to vector<1x8xf32>
    %21 = vector.broadcast %20 : vector<1x8xf32> to vector<16x8xf32>
    %22 = arith.addf %18, %21 : vector<16x8xf32>
    %cst_22 = arith.constant 0.353553385 : f32
    %23 = vector.broadcast %cst_22 : f32 to vector<16x8xf32>
    %24 = arith.mulf %8, %23 : vector<16x8xf32>
    %25 = vector.shape_cast %24 : vector<16x8xf32> to vector<2x8x8xf32>
    %26 = vector.shape_cast %15 : vector<16x8xf32> to vector<2x8x8xf32>
    %27 = vector.shape_cast %22 : vector<16x8xf32> to vector<2x8x8xf32>
    "tpu.trace_start"() <{level = 10 : i32, message = "bqd,bkd->bqk"}> : () -> ()
    %cst_23 = arith.constant dense<0.000000e+00> : vector<2x8x8xf32>
    %28 = tpu.matmul %25, %26, %cst_23 {dimension_numbers = #tpu.dot_dimension_numbers<[2], [2], [1], [1], [0, 0, 0, 1, 1, 1], [0], [0]>} : vector<2x8x8xf32>, vector<2x8x8xf32>, vector<2x8x8xf32> -> vector<2x8x8xf32>
    "tpu.trace_stop"() : () -> ()
    %cst_24 = arith.constant dense<0xFF800000> : vector<2x8xf32>
    %29 = vector.multi_reduction <maximumf>, %28, %cst_24 [2] : vector<2x8x8xf32> to vector<2x8xf32>
    %30 = vector.shape_cast %29 : vector<2x8xf32> to vector<2x8x1xf32>
    %31 = vector.broadcast %30 : vector<2x8x1xf32> to vector<2x8x8xf32>
    %32 = arith.subf %28, %31 : vector<2x8x8xf32>
    %33 = math.exp %32 : vector<2x8x8xf32>
    %cst_25 = arith.constant dense<0.000000e+00> : vector<2x8xf32>
    %34 = vector.multi_reduction <add>, %33, %cst_25 [2] : vector<2x8x8xf32> to vector<2x8xf32>
    %35 = vector.shape_cast %34 : vector<2x8xf32> to vector<2x8x1xf32>
    %36 = tpu.reciprocal %35 {approx = true} : vector<2x8x1xf32> -> vector<2x8x1xf32>
    %37 = vector.broadcast %36 : vector<2x8x1xf32> to vector<2x8x8xf32>
    %38 = arith.mulf %33, %37 : vector<2x8x8xf32>
    "tpu.trace_start"() <{level = 10 : i32, message = "bqk,bkd->bqd"}> : () -> ()
    %cst_26 = arith.constant dense<0.000000e+00> : vector<2x8x8xf32>
    %39 = tpu.matmul %38, %27, %cst_26 {dimension_numbers = #tpu.dot_dimension_numbers<[2], [1], [1], [2], [0, 0, 0, 1, 1, 2], [0], [0]>} : vector<2x8x8xf32>, vector<2x8x8xf32>, vector<2x8x8xf32> -> vector<2x8x8xf32>
    "tpu.trace_stop"() : () -> ()
    %40 = vector.shape_cast %39 : vector<2x8x8xf32> to vector<16x8xf32>
    %c0_i32 = arith.constant 0 : i32
    %41 = arith.cmpi eq, %arg1, %c0_i32 : i32
    %42 = arith.extui %41 : i1 to i32
    %c0_i32_27 = arith.constant 0 : i32
    %43 = arith.cmpi ne, %42, %c0_i32_27 : i32
    scf.if %43 {
      %c0_37 = arith.constant 0 : index
      %c0_38 = arith.constant 0 : index
      %53 = vector.load %arg10[%c0_37, %c0_38] : memref<1x32xf32, #tpu.memory_space<vmem>>, vector<1x32xf32>
      %54 = vector.broadcast %53 : vector<1x32xf32> to vector<16x32xf32>
      %55 = arith.addf %1, %54 : vector<16x32xf32>
      %c0_39 = arith.constant 0 : index
      %c0_40 = arith.constant 0 : index
      %56 = vector.load %arg14[%c0_39, %c0_40] : memref<16x32xf32, #tpu.memory_space<vmem>>, vector<16x32xf32>
      tpu.vector_store %arg14[%c0_39, %c0_40], %55 {strides = array<i32>} : memref<16x32xf32, #tpu.memory_space<vmem>>, vector<16x32xf32>,
    } else {
    }
    %c0_28 = arith.constant 0 : index
    %c0_29 = arith.constant 0 : index
    %44 = vector.load %arg14[%c0_28, %c0_29] : memref<16x32xf32, #tpu.memory_space<vmem>>, vector<16x32xf32>
    %c0_30 = arith.constant 0 : index
    %c0_31 = arith.constant 0 : index
    %c0_32 = arith.constant 0 : index
    %45 = vector.load %arg9[%c0_30, %c0_31, %c0_32] : memref<1x8x32xf32, #tpu.memory_space<vmem>>, vector<1x8x32xf32>
    %46 = vector.shape_cast %45 : vector<1x8x32xf32> to vector<8x32xf32>
    %cst_33 = arith.constant dense<0.000000e+00> : vector<16x32xf32>
    %47 = tpu.matmul %40, %46, %cst_33 {dimension_numbers = #tpu.dot_dimension_numbers<[1], [0], [0], [1], [0, 0, 1, 1], [], []>} : vector<16x8xf32>, vector<8x32xf32>, vector<16x32xf32> -> vector<16x32xf32>
    %48 = arith.addf %44, %47 : vector<16x32xf32>
    %c0_34 = arith.constant 0 : index
    %c0_35 = arith.constant 0 : index
    %49 = vector.load %arg14[%c0_34, %c0_35] : memref<16x32xf32, #tpu.memory_space<vmem>>, vector<16x32xf32>
    tpu.vector_store %arg14[%c0_34, %c0_35], %48 {strides = array<i32>} : memref<16x32xf32, #tpu.memory_space<vmem>>, vector<16x32xf32>,
    %c3_i32 = arith.constant 3 : i32
    %50 = arith.cmpi eq, %arg1, %c3_i32 : i32
    %51 = arith.extui %50 : i1 to i32
    %c0_i32_36 = arith.constant 0 : i32
    %52 = arith.cmpi ne, %51, %c0_i32_36 : i32
    scf.if %52 {
      %c0_37 = arith.constant 0 : index
      %c0_38 = arith.constant 0 : index
      %53 = vector.load %arg14[%c0_37, %c0_38] : memref<16x32xf32, #tpu.memory_space<vmem>>, vector<16x32xf32>
      %cst_39 = arith.constant dense<0.000000e+00> : vector<16xf32>
      %54 = vector.multi_reduction <add>, %53, %cst_39 [1] : vector<16x32xf32> to vector<16xf32>
      %55 = vector.shape_cast %54 : vector<16xf32> to vector<16x1xf32>
      %cst_40 = arith.constant 3.200000e+01 : f32
      %56 = vector.broadcast %cst_40 : f32 to vector<16x1xf32>
      %57 = arith.divf %55, %56 : vector<16x1xf32>
      %58 = vector.broadcast %57 : vector<16x1xf32> to vector<16x32xf32>
      %59 = arith.subf %53, %58 : vector<16x32xf32>
      %60 = arith.mulf %59, %59 : vector<16x32xf32>
      %cst_41 = arith.constant dense<0.000000e+00> : vector<16xf32>
      %61 = vector.multi_reduction <add>, %60, %cst_41 [1] : vector<16x32xf32> to vector<16xf32>
      %62 = vector.shape_cast %61 : vector<16xf32> to vector<16x1xf32>
      %cst_42 = arith.constant 3.200000e+01 : f32
      %63 = vector.broadcast %cst_42 : f32 to vector<16x1xf32>
      %64 = arith.divf %62, %63 : vector<16x1xf32>
      %65 = vector.broadcast %57 : vector<16x1xf32> to vector<16x32xf32>
      %66 = arith.subf %53, %65 : vector<16x32xf32>
      %cst_43 = arith.constant 9.99999974E-6 : f32
      %67 = vector.broadcast %cst_43 : f32 to vector<16x1xf32>
      %68 = arith.addf %64, %67 : vector<16x1xf32>
      %69 = math.rsqrt %68 : vector<16x1xf32>
      %70 = vector.broadcast %69 : vector<16x1xf32> to vector<16x32xf32>
      %71 = arith.mulf %66, %70 : vector<16x32xf32>
      %c0_44 = arith.constant 0 : index
      %c0_45 = arith.constant 0 : index
      %72 = vector.load %arg11[%c0_44, %c0_45] : memref<1x32xf32, #tpu.memory_space<vmem>>, vector<1x32xf32>
      %73 = vector.broadcast %72 : vector<1x32xf32> to vector<16x32xf32>
      %74 = arith.mulf %71, %73 : vector<16x32xf32>
      %c0_46 = arith.constant 0 : index
      %c0_47 = arith.constant 0 : index
      %75 = vector.load %arg12[%c0_46, %c0_47] : memref<1x32xf32, #tpu.memory_space<vmem>>, vector<1x32xf32>
      %76 = vector.broadcast %75 : vector<1x32xf32> to vector<16x32xf32>
      %77 = arith.addf %74, %76 : vector<16x32xf32>
      %78 = vector.shape_cast %77 : vector<16x32xf32> to vector<2x8x32xf32>
      %c0_48 = arith.constant 0 : index
      %c0_49 = arith.constant 0 : index
      %c0_50 = arith.constant 0 : index
      %79 = vector.load %arg13[%c0_48, %c0_49, %c0_50] : memref<2x8x32xf32, #tpu.memory_space<vmem>>, vector<2x8x32xf32>
      tpu.vector_store %arg13[%c0_48, %c0_49, %c0_50], %78 {strides = array<i32>} : memref<2x8x32xf32, #tpu.memory_space<vmem>>, vector<2x8x32xf32>,
    } else {
    }
    return
  }
  func.func @transform_0(%arg0: i32, %arg1: i32) -> (i32, i32, i32) {
    %c0_i32 = arith.constant 0 : i32
    %c0_i32_0 = arith.constant 0 : i32
    %c0_i32_1 = arith.constant 0 : i32
    return %arg0, %c0_i32, %c0_i32_0 : i32, i32, i32
  }
  func.func @transform_1(%arg0: i32, %arg1: i32) -> (i32, i32, i32) {
    %c0_i32 = arith.constant 0 : i32
    %c0_i32_0 = arith.constant 0 : i32
    %c0_i32_1 = arith.constant 0 : i32
    return %arg1, %c0_i32, %c0_i32_0 : i32, i32, i32
  }
  func.func @transform_2(%arg0: i32, %arg1: i32) -> (i32, i32, i32) {
    %c0_i32 = arith.constant 0 : i32
    %c0_i32_0 = arith.constant 0 : i32
    %c0_i32_1 = arith.constant 0 : i32
    return %arg1, %c0_i32, %c0_i32_0 : i32, i32, i32
  }
  func.func @transform_3(%arg0: i32, %arg1: i32) -> (i32, i32, i32) {
    %c0_i32 = arith.constant 0 : i32
    %c0_i32_0 = arith.constant 0 : i32
    %c0_i32_1 = arith.constant 0 : i32
    return %arg1, %c0_i32, %c0_i32_0 : i32, i32, i32
  }
  func.func @transform_4(%arg0: i32, %arg1: i32) -> (i32, i32, i32) {
    %c0_i32 = arith.constant 0 : i32
    %c0_i32_0 = arith.constant 0 : i32
    %c0_i32_1 = arith.constant 0 : i32
    return %arg1, %c0_i32, %c0_i32_0 : i32, i32, i32
  }
  func.func @transform_5(%arg0: i32, %arg1: i32) -> (i32, i32, i32) {
    %c0_i32 = arith.constant 0 : i32
    %c0_i32_0 = arith.constant 0 : i32
    %c0_i32_1 = arith.constant 0 : i32
    return %arg1, %c0_i32, %c0_i32_0 : i32, i32, i32
  }
  func.func @transform_6(%arg0: i32, %arg1: i32) -> (i32, i32, i32) {
    %c0_i32 = arith.constant 0 : i32
    %c0_i32_0 = arith.constant 0 : i32
    %c0_i32_1 = arith.constant 0 : i32
    return %arg1, %c0_i32, %c0_i32_0 : i32, i32, i32
  }
  func.func @transform_7(%arg0: i32, %arg1: i32) -> (i32, i32, i32) {
    %c0_i32 = arith.constant 0 : i32
    %c0_i32_0 = arith.constant 0 : i32
    %c0_i32_1 = arith.constant 0 : i32
    return %arg1, %c0_i32, %c0_i32_0 : i32, i32, i32
  }
  func.func @transform_8(%arg0: i32, %arg1: i32) -> (i32, i32) {
    %c0_i32 = arith.constant 0 : i32
    %c0_i32_0 = arith.constant 0 : i32
    %c0_i32_1 = arith.constant 0 : i32
    return %c0_i32, %c0_i32_0 : i32, i32
  }
  func.func @transform_9(%arg0: i32, %arg1: i32) -> (i32, i32) {
    %c0_i32 = arith.constant 0 : i32
    %c0_i32_0 = arith.constant 0 : i32
    %c0_i32_1 = arith.constant 0 : i32
    return %c0_i32, %c0_i32_0 : i32, i32
  }
  func.func @transform_10(%arg0: i32, %arg1: i32) -> (i32, i32) {
    %c0_i32 = arith.constant 0 : i32
    %c0_i32_0 = arith.constant 0 : i32
    %c0_i32_1 = arith.constant 0 : i32
    return %c0_i32, %c0_i32_0 : i32, i32
  }
  func.func @transform_11(%arg0: i32, %arg1: i32) -> (i32, i32, i32) {
    %c0_i32 = arith.constant 0 : i32
    %c0_i32_0 = arith.constant 0 : i32
    %c0_i32_1 = arith.constant 0 : i32
    return %arg0, %c0_i32, %c0_i32_0 : i32, i32, i32
  }
}

</mosaic_0001>

<bundles_post_ra>
// kernel: tpu_custom_call.1
= control target key start
LH: loop header
LB: loop body
LE: loop exit
PB: predicated region body
PF: predicated region fallthrough
CT: control target
= control target key end

     0   :  { %s3022_s0 = inlined_call_operand.hbm [shape: f32[2,8,32], index: 0, kind: input, shape index: {}]   ;;  %s3023_s1 = inlined_call_operand.hbm [shape: f32[4,32,8], index: 1, kind: input, shape index: {}]   ;;  %s3024_s2 = inlined_call_operand.hbm [shape: f32[4,32,8], index: 2, kind: input, shape index: {}]   ;;  %s3025_s3 = inlined_call_operand.hbm [shape: f32[4,32,8], index: 3, kind: input, shape index: {}]   ;;  %s3026_s4 = inlined_call_operand.hbm [shape: f32[4,1,8], index: 4, kind: input, shape index: {}]   ;;  %s3027_s5 = inlined_call_operand.hbm [shape: f32[4,1,8], index: 5, kind: input, shape index: {}]   ;;  %s3028_s6 = inlined_call_operand.hbm [shape: f32[4,1,8], index: 6, kind: input, shape index: {}]   ;;  %s3029_s7 = inlined_call_operand.hbm [shape: f32[4,8,32], index: 7, kind: input, shape index: {}]   ;;  %s3030_s8 = inlined_call_operand.hbm [shape: f32[1,32], index: 8, kind: input, shape index: {}]   ;;  %s3031_s9 = inlined_call_operand.hbm [shape: f32[1,32], index: 9, kind: input, shape index: {}]   ;;  %s3032_s10 = inlined_call_operand.hbm [shape: f32[1,32], index: 10, kind: input, shape index: {}]   ;;  %s3033_s11 = inlined_call_operand.hbm [shape: f32[2,8,32], index: 11, kind: output, shape index: {}]  }
   0x1   :  { %3060 = sst [smem:[#allocation38_spill]] %s3023_s1 }
   0x2   :  { %3061 = sst [smem:[#allocation39_spill]] %s3025_s3 }
   0x3   :  { %3062 = sst [smem:[#allocation40_spill]] %s3027_s5 }
   0x4   :  { %3063 = sst [smem:[#allocation41_spill]] %s3030_s8 }
   0x5   :  { %3064 = sst [smem:[#allocation42_spill]] %s3031_s9 }
   0x6   :  { %3065 = sst [smem:[#allocation43_spill]] %s3033_s11 }
   0x7   :  { %16 = vsyncpa [#allocation4], 0 }
   0x8   :  { %17 = vsyncpa [#allocation7], 0 }
   0x9   :  { %19 = vsyncpa [#allocation7 + $0x1], 0 }
   0xa   :  { %20 = vsyncpa [#allocation10], 0 }
   0xb   :  { %22 = vsyncpa [#allocation10 + $0x1], 0 }
   0xc   :  { %23 = vsyncpa [#allocation13], 0 }
   0xd   :  { %25 = vsyncpa [#allocation13 + $0x1], 0 }
   0xe   :  { %26 = vsyncpa [#allocation16], 0 }
   0xf   :  { %28 = vsyncpa [#allocation16 + $0x1], 0 }
  0x10   :  { %29 = vsyncpa [#allocation19], 0 }
  0x11   :  { %30 = vsyncpa [#allocation5], 0  ;;  %s2490_s17 = smov 0   ;;  %s2492_s18 = smov 0  }
  0x12   :  { %s2494_s19 = smov 0   ;;  %s2496_s20 = smov 0  }
  0x13   :  { %s2498_s21 = smov 0   ;;  %s2500_s22 = smov 0  }
  0x14 LB: > { %3066 = sst [smem:[#allocation30_spill]] %s2394_s18  ;;  %s2519_s23 = sadd.s32 4294967295, %s2410_s22   ;;  %s2410_s22 = sphi %s2500_s22, %s36_s22   ;;  %s2406_s21 = sphi %s2498_s21, %s3121_s21   ;;  %s2402_s20 = sphi %s2496_s20, %s3120_s20   ;;  %s2398_s19 = sphi %s2494_s19, %s3118_s19   ;;  %s2394_s18 = sphi %s2492_s18, %s3117_s18   ;;  %s2390_s17 = sphi %s2490_s17, %s3116_s17  }
  0x15   : > { %3067 = sst [smem:[#allocation31_spill]] %s2398_s19  ;;  %p88_p0 = scmp.ne.s32.totalorder %s2398_s19, %s2394_s18 }
  0x16   : > { %3068 = sst [smem:[#allocation32_spill]] %s2402_s20  ;;  %p89_p1 = scmp.eq.s32.totalorder %s2410_s22, 0 }
  0x17   : > { %3069 = sst [smem:[#allocation33_spill]] %s2410_s22  ;;  %p94_p2 = scmp.ne.s32.totalorder %s2394_s18, %s2390_s17 }
  0x18   : > { %3070 = sst [smem:[#allocation34_spill]] %s2519_s23  ;;  %p3035_p3 = scmp.eq.s32.totalorder %s2519_s23, 0 }
  0x19   : > { %p90_p4 = por %p89_p1, %p88_p0  ;;  %p1664_p5 = scmp.ge.s32.totalorder %s2410_s22, 1 }
  0x1a   : > { %p2530_p6 = por %p3035_p3, %p94_p2  ;;  %p350_p7 = scmp.lt.s32.totalorder %s2410_s22, 5 }
  0x1b   : > { %s2412_s27 = smov [#allocation17]   ;;  %p1906_p10 = scmp.lt.s32.totalorder %s2410_s22, 4 }
  0x1c   : > { %s3071_s25 = scalar_select %p2530_p6, 1, 0 }
  0x1d   : > { %p2535_p8 = pnand %p1664_p5, %p350_p7  ;;  %s379_s28 = sshll.u32 %s2412_s27, 4  ;;  %s380_s28 = int_to_ptr.vmem [resolvable:$true] %s379_s28 }
  0x1e   : > { %3072 = sst [smem:[#allocation35_spill]] %s3071_s25  ;;  %p2548_p12 = pnand %p1906_p10, %p90_p4 }
  0x1f   : > { %s3073_s26 = scalar_select %p2535_p8, 1, 0 }
  0x20   : > { %p1867_p9 = pneg %p2535_p8  ;;  %s2413_s12 = smov [#allocation18]  }
  0x21   : > { %s3075_s30 = scalar_select %p2548_p12, 1, 0 }
  0x22   : > { %p2544_p11 = pnand %p1867_p9, %p3035_p3  ;;  %s390_s13 = sshll.u32 %s2413_s12, 4  ;;  %s391_s13 = int_to_ptr.vmem [resolvable:$true] %s390_s13 }
  0x23   : > { %s3076_s8 = sld [smem:[#allocation41_spill]] }
  0x24   : > { %s3074_s29 = scalar_select %p2544_p11, 1, 0 }
  0x25   : > { %p2560_p0 = pneg %p2544_p11 }
  0x27   : > { %s3077_s24 = scalar_select %p2560_p0, 1, 0 }
  0x29   : > { %s1984_s16 = scalar_lea.hbm %s3076_s8, 16 }
  0x2a   : > { %p1985_p13 = scmp.ne.s32.totalorder %s3076_s8, %s1984_s16  ;;  %p1991_p4 = scmp.lt.u32.totalorder %s1984_s16, %s3076_s8 }
  0x2c   : > { %p1987_p1 = pnand %p2560_p0, %p1985_p13 }
  0x2e   : > { %p1988_p2 = pneg %p1987_p1 }
  0x30   : > { %p1993_p5 = pnand %p1991_p4, %p1988_p2 }
  0x32   : > { %1996 = shalt.err (!%p1993_p5)
}
  0x33   : > { %s1997_s12 = scalar_lea.vmem %s380_s28, 16  ;;  %s2004_s14 = scalar_lea.vmem %s380_s28, 32 }
  0x34   : > { %p1998_p7 = scmp.ne.s32.totalorder %s380_s28, %s1997_s12  ;;  %p2005_p3 = scmp.lt.s32.totalorder %s380_s28, %s380_s28 }
  0x35   : > { %p2006_p6 = scmp.lt.s32.totalorder %s2004_s14, %s1997_s12 }
  0x36   : > { %p2000_p9 = pnand %p1998_p7, %p2560_p0 }
  0x37   : > { %p2007_p8 = por %p2006_p6, %p2005_p3 }
  0x38   : > { %p2001_p10 = pneg %p2000_p9 }
  0x3a   : > { %p2008_p12 = pnand %p2007_p8, %p2001_p10 }
  0x3c   : > { %2011 = shalt.err (!%p2008_p12)
}
  0x3d   : > { %1873 = dma.hbm_to_vmem [thread:$0]  (!%p2544_p11), %s3076_s8, 16, %s380_s28, [#allocation16]  }
  0x3e   : > { %s45_s11 = sadd.s32 1, %s2406_s21  ;;  %s3078_s9 = sld [smem:[#allocation42_spill]] }
  0x44   : > { %s2012_s27 = scalar_lea.hbm %s3078_s9, 16 }
  0x45   : > { %p2013_p3 = scmp.ne.s32.totalorder %s3078_s9, %s2012_s27  ;;  %p2019_p12 = scmp.lt.u32.totalorder %s2012_s27, %s3078_s9 }
  0x47   : > { %p2015_p6 = pnand %p2013_p3, %p2560_p0 }
  0x49   : > { %p2016_p8 = pneg %p2015_p6 }
  0x4b   : > { %p2021_p13 = pnand %p2019_p12, %p2016_p8 }
  0x4d   : > { %2024 = shalt.err (!%p2021_p13)
}
  0x4e   : > { %s2025_s28 = scalar_lea.vmem %s391_s13, 16  ;;  %s2032_s15 = scalar_lea.vmem %s391_s13, 32 }
  0x4f   : > { %p2026_p1 = scmp.ne.s32.totalorder %s391_s13, %s2025_s28  ;;  %p2033_p5 = scmp.lt.s32.totalorder %s391_s13, %s391_s13 }
  0x50   : > { %p2034_p7 = scmp.lt.s32.totalorder %s2032_s15, %s2025_s28 }
  0x51   : > { %p2028_p2 = pnand %p2026_p1, %p2560_p0 }
  0x52   : > { %p2035_p9 = por %p2034_p7, %p2033_p5 }
  0x53   : > { %p2029_p4 = pneg %p2028_p2 }
  0x55   : > { %p2036_p10 = pnand %p2035_p9, %p2029_p4 }
  0x57   : > { %2039 = shalt.err (!%p2036_p10)
}
  0x58   : > { %1876 = dma.hbm_to_vmem [thread:$0]  (!%p2544_p11), %s3078_s9, 16, %s391_s13, [#allocation19]  }
  0x59   : > { %p46_p3 = scmp.ge.s32.totalorder %s45_s11, 4  ;;  %s2596_s17 = sand.u32 1, %s2410_s22  }
  0x5a   : > { %s2601_s20 = sand.u32 1, %s2398_s19   ;;  %s2609_s12 = sshll.u32 %s2406_s21, 9 }
  0x5b   : > { %s3123_s11 = smov (%p46_p3, %s45_s11), 0  ;;  %s2606_s27 = sshll.u32 %s2601_s20, 5 }
  0x5c   : > { %3079 = sst [smem:[#allocation36_spill]] %s3123_s11  ;;  %s78_s16 = ssub.s32 %s2406_s21, %s3123_s11 }
  0x5d   : > { %p79_p6 = scmp.eq.s32.totalorder %s78_s16, 0  ;;  %s416_s13 = scalar_lea.vmem [#allocation6], %s2606_s27 }
  0x5e   : > { %s423_s14 = sshll.u32 %s416_s13, 4  ;;  %s3080_s28 = sadd.s32 1, %s2398_s19  ;;  %s2623_s14 = int_to_ptr.vmem [resolvable:$true] %s423_s14 }
  0x5f   : > { %s2615_s15 = scalar_select %p79_p6, %s2398_s19, %s3080_s28  }
  0x60   : > { %s3082_s1 = sld [smem:[#allocation38_spill]]  ;;  %p3083_p12 = scmp.ne.s32.totalorder %s3075_s30, 0 }
  0x61   : > { %3081 = sst [smem:[#allocation37_spill]] %s2615_s15 }
  0x62   : > { %p2630_p13 = pneg %p3083_p12 }
  0x64   : > { %s3084_s13 = scalar_select %p2630_p13, 1, 0 }
  0x66   : > { %s2621_s8 = scalar_lea.hbm %s3082_s1, %s2609_s12  ;;  %s2045_s25 = scalar_lea.hbm %s3082_s1, 2048 }
  0x67   : > { %s2040_s9 = scalar_lea.hbm %s2621_s8, 512  ;;  %p2046_p4 = scmp.lt.u32.totalorder %s2621_s8, %s3082_s1 }
  0x68   : > { %p2041_p8 = scmp.ne.s32.totalorder %s2621_s8, %s2040_s9  ;;  %p2047_p5 = scmp.lt.u32.totalorder %s2045_s25, %s2040_s9 }
  0x69   : > { %p2049_p9 = scmp.lt.u32.totalorder %s2040_s9, %s2621_s8 }
  0x6a   : > { %p2043_p1 = pnand %p2630_p13, %p2041_p8  ;;  %p2048_p7 = por %p2047_p5, %p2046_p4 }
  0x6c   : > { %p2044_p2 = pneg %p2043_p1  ;;  %p2050_p10 = por %p2049_p9, %p2048_p7 }
  0x6e   : > { %p2051_p3 = pnand %p2050_p10, %p2044_p2 }
  0x70   : > { %2054 = shalt.err (!%p2051_p3)
}
  0x71   : > { %s2055_s16 = scalar_lea.vmem %s2623_s14, 512  ;;  %s2414_s28 = smov [#allocation6]  }
  0x72   : > { %p2056_p6 = scmp.ne.s32.totalorder %s2623_s14, %s2055_s16  ;;  %s2060_s18 = sshll.u32 %s2414_s28, 4  ;;  %s2061_s18 = int_to_ptr.vmem [resolvable:$false] %s2060_s18 }
  0x73   : > { %s2062_s11 = scalar_lea.vmem %s2061_s18, 1024  ;;  %p2063_p11 = scmp.lt.s32.totalorder %s2623_s14, %s2061_s18 }
  0x74   : > { %p2058_p8 = pnand %p2056_p6, %p2630_p13  ;;  %p2064_p0 = scmp.lt.s32.totalorder %s2062_s11, %s2055_s16 }
  0x76   : > { %p2059_p1 = pneg %p2058_p8  ;;  %p2065_p4 = por %p2064_p0, %p2063_p11 }
  0x78   : > { %p2066_p5 = pnand %p2065_p4, %p2059_p1 }
  0x7a   : > { %2069 = shalt.err (!%p2066_p5)
}
  0x7b   : > { %s3053_s9 = smov 128   ;;  %s3056_s15 = smov 8  }
  0x7c   : > { %s3085_s25 = scalar_lea.sflag [#allocation7], %s2596_s17  ;;  %s3086_s3 = sld [smem:[#allocation39_spill]] }
  0x7d   : > { %1883 = dma.hbm_to_vmem [thread:$0]  (!%p3083_p12), %s2621_s8, 512, %s2623_s14, %s3085_s25, %s3053_s9, %s3053_s9, %s3056_s15  }
  0x7e   : > { %s458_s11 = scalar_lea.vmem [#allocation9], %s2606_s27  ;;  %s2668_s19 = sshll.u32 %s2406_s21, 4 }
  0x7f   : > { %s465_s1 = sshll.u32 %s458_s11, 4  ;;  %s3052_s22 = scalar_lea.sflag [#allocation10], %s2596_s17  ;;  %s2665_s1 = int_to_ptr.vmem [resolvable:$true] %s465_s1 }
  0x82   : > { %s2662_s18 = scalar_lea.hbm %s3086_s3, %s2609_s12  ;;  %s2075_s25 = scalar_lea.hbm %s3086_s3, 2048 }
  0x83   : > { %s2070_s23 = scalar_lea.hbm %s2662_s18, 512  ;;  %p2076_p7 = scmp.lt.u32.totalorder %s2662_s18, %s3086_s3 }
  0x84   : > { %p2071_p11 = scmp.ne.s32.totalorder %s2662_s18, %s2070_s23  ;;  %p2077_p9 = scmp.lt.u32.totalorder %s2075_s25, %s2070_s23 }
  0x85   : > { %p2079_p3 = scmp.lt.u32.totalorder %s2070_s23, %s2662_s18 }
  0x86   : > { %p2073_p0 = pnand %p2071_p11, %p2630_p13  ;;  %p2078_p10 = por %p2077_p9, %p2076_p7 }
  0x88   : > { %p2074_p2 = pneg %p2073_p0  ;;  %p2080_p6 = por %p2079_p3, %p2078_p10 }
  0x8a   : > { %p2081_p8 = pnand %p2080_p6, %p2074_p2 }
  0x8c   : > { %2084 = shalt.err (!%p2081_p8)
}
  0x8d   : > { %s2085_s11 = scalar_lea.vmem %s2665_s1, 512  ;;  %s2417_s8 = smov [#allocation9]  }
  0x8e   : > { %p2086_p1 = scmp.ne.s32.totalorder %s2665_s1, %s2085_s11  ;;  %s2090_s14 = sshll.u32 %s2417_s8, 4  ;;  %s2091_s14 = int_to_ptr.vmem [resolvable:$false] %s2090_s14 }
  0x8f   : > { %s2092_s16 = scalar_lea.vmem %s2091_s14, 1024  ;;  %p2093_p11 = scmp.lt.s32.totalorder %s2665_s1, %s2091_s14 }
  0x90   : > { %p2088_p4 = pnand %p2086_p1, %p2630_p13  ;;  %p2094_p0 = scmp.lt.s32.totalorder %s2092_s16, %s2085_s11 }
  0x92   : > { %p2089_p5 = pneg %p2088_p4  ;;  %p2095_p7 = por %p2094_p0, %p2093_p11 }
  0x94   : > { %p2096_p9 = pnand %p2095_p7, %p2089_p5 }
  0x96   : > { %2099 = shalt.err (!%p2096_p9)
}
  0x97   : > { %1889 = dma.hbm_to_vmem [thread:$0]  (!%p3083_p12), %s2662_s18, 512, %s2665_s1, %s3052_s22, %s3053_s9, %s3053_s9, %s3056_s15  }
  0x98   : > { %s3087_s5 = sld [smem:[#allocation40_spill]]  ;;  %s495_s11 = scalar_lea.vmem [#allocation12], %s2601_s20 }
  0x99   : > { %s502_s8 = sshll.u32 %s495_s11, 4  ;;  %s493_s14 = scalar_lea.sflag [#allocation13], %s2596_s17  ;;  %s503_s8 = int_to_ptr.vmem [resolvable:$true] %s502_s8 }
  0x9e   : > { %s2701_s28 = scalar_lea.hbm %s3087_s5, %s2668_s19  ;;  %s2105_s18 = scalar_lea.hbm %s3087_s5, 64 }
  0x9f   : > { %s2100_s16 = scalar_lea.hbm %s2701_s28, 16  ;;  %p2106_p6 = scmp.lt.u32.totalorder %s2701_s28, %s3087_s5 }
  0xa0   : > { %p2101_p2 = scmp.ne.s32.totalorder %s2701_s28, %s2100_s16  ;;  %p2107_p8 = scmp.lt.u32.totalorder %s2105_s18, %s2100_s16 }
  0xa1   : > { %p2109_p4 = scmp.lt.u32.totalorder %s2100_s16, %s2701_s28 }
  0xa2   : > { %p2103_p10 = pnand %p2101_p2, %p2630_p13  ;;  %p2108_p1 = por %p2107_p8, %p2106_p6 }
  0xa4   : > { %p2104_p3 = pneg %p2103_p10  ;;  %p2110_p5 = por %p2109_p4, %p2108_p1 }
  0xa6   : > { %p2111_p11 = pnand %p2110_p5, %p2104_p3 }
  0xa8   : > { %2114 = shalt.err (!%p2111_p11)
}
  0xa9   : > { %s2115_s11 = scalar_lea.vmem %s503_s8, 16  ;;  %s2418_s22 = smov [#allocation12]  }
  0xaa   : > { %p2116_p0 = scmp.ne.s32.totalorder %s503_s8, %s2115_s11  ;;  %s2120_s9 = sshll.u32 %s2418_s22, 4  ;;  %s2121_s9 = int_to_ptr.vmem [resolvable:$false] %s2120_s9 }
  0xab   : > { %s2122_s3 = scalar_lea.vmem %s2121_s9, 32  ;;  %p2123_p2 = scmp.lt.s32.totalorder %s503_s8, %s2121_s9 }
  0xac   : > { %p2118_p7 = pnand %p2116_p0, %p2630_p13  ;;  %p2124_p10 = scmp.lt.s32.totalorder %s2122_s3, %s2115_s11 }
  0xae   : > { %p2119_p9 = pneg %p2118_p7  ;;  %p2125_p12 = por %p2124_p10, %p2123_p2 }
  0xb0   : > { %p2126_p6 = pnand %p2125_p12, %p2119_p9 }
  0xb2   : > { %2129 = shalt.err (!%p2126_p6)
}
  0xb3   : > { %p3088_p8 = scmp.ne.s32.totalorder %s3075_s30, 0  ;;  %s2419_s16 = smov [#allocation3]  }
  0xb4   : > { %s365_s1 = sshll.u32 %s2419_s16, 4  ;;  %s2420_s18 = smov [#allocation20]   ;;  %s366_s1 = int_to_ptr.vmem [resolvable:$true] %s365_s1 }
  0xb5   : > { %1895 = dma.hbm_to_vmem [thread:$0]  (!%p3088_p8), %s2701_s28, 16, %s503_s8, %s493_s14  }
  0xb6   : > { %s401_s23 = sshll.u32 %s2420_s18, 4  ;;  %s2130_s9 = scalar_lea.hbm %s3022_s0, 256  ;;  %s402_s23 = int_to_ptr.vmem [resolvable:$true] %s401_s23 }
  0xb7   : > { %p2131_p12 = scmp.ne.s32.totalorder %s3022_s0, %s2130_s9  ;;  %p3089_p3 = scmp.ne.s32.totalorder %s3077_s24, 0 }
  0xb8   : > { %p2137_p5 = scmp.lt.u32.totalorder %s2130_s9, %s3022_s0 }
  0xb9   : > { %p2133_p1 = pnand %p2131_p12, %p3089_p3 }
  0xbb   : > { %p2134_p4 = pneg %p2133_p1 }
  0xbd   : > { %p2139_p11 = pnand %p2137_p5, %p2134_p4 }
  0xbf   : > { %2142 = shalt.err (!%p2139_p11)
}
  0xc0   : > { %s2143_s28 = scalar_lea.vmem %s366_s1, 256  ;;  %p2151_p2 = scmp.lt.s32.totalorder %s366_s1, %s366_s1 }
  0xc1   : > { %p2144_p0 = scmp.ne.s32.totalorder %s366_s1, %s2143_s28  ;;  %p2152_p10 = scmp.lt.s32.totalorder %s2143_s28, %s2143_s28 }
  0xc3   : > { %p2146_p7 = pnand %p2144_p0, %p3089_p3  ;;  %p2153_p6 = por %p2152_p10, %p2151_p2 }
  0xc5   : > { %p2147_p9 = pneg %p2146_p7 }
  0xc7   : > { %p2154_p8 = pnand %p2153_p6, %p2147_p9 }
  0xc9   : > { %2157 = shalt.err (!%p2154_p8)
}
  0xca   : > { %p3090_p12 = scmp.ne.s32.totalorder %s3074_s29, 0  ;;  %s3091_s8 = smov 8  }
  0xcb   : > { %s3092_s16 = smov 128   ;;  %s2158_s25 = scalar_lea.hbm %s3032_s10, 16 }
  0xcc   : > { %1870 = dma.hbm_to_vmem [thread:$0]  (!%p3090_p12), %s3022_s0, 256, %s366_s1, [#allocation4], %s3092_s16, %s3092_s16, %s3091_s8  }
  0xcd   : > { %p2159_p1 = scmp.ne.s32.totalorder %s3032_s10, %s2158_s25  ;;  %p2165_p5 = scmp.lt.u32.totalorder %s2158_s25, %s3032_s10 }
  0xcf   : > { %p2161_p8 = pnand %p2159_p1, %p3089_p3 }
  0xd1   : > { %p2162_p4 = pneg %p2161_p8 }
  0xd3   : > { %p2167_p11 = pnand %p2165_p5, %p2162_p4 }
  0xd5   : > { %2170 = shalt.err (!%p2167_p11)
}
  0xd6   : > { %s2171_s5 = scalar_lea.vmem %s402_s23, 16  ;;  %s2178_s1 = scalar_lea.vmem %s402_s23, 32 }
  0xd7   : > { %p2172_p0 = scmp.ne.s32.totalorder %s402_s23, %s2171_s5  ;;  %p2179_p2 = scmp.lt.s32.totalorder %s402_s23, %s402_s23 }
  0xd8   : > { %p2180_p10 = scmp.lt.s32.totalorder %s2178_s1, %s2171_s5 }
  0xd9   : > { %p2174_p7 = pnand %p2172_p0, %p3089_p3 }
  0xda   : > { %p2181_p6 = por %p2180_p10, %p2179_p2 }
  0xdb   : > { %p2175_p9 = pneg %p2174_p7 }
  0xdd   : > { %p2182_p13 = pnand %p2181_p6, %p2175_p9 }
  0xdf   : > { %2185 = shalt.err (!%p2182_p13)
}
  0xe0   : > { %1879 = dma.hbm_to_vmem [thread:$0]  (!%p3090_p12), %s3032_s10, 16, %s402_s23, [#allocation19]  }
  0xe1   : > { %s2767_s24 = scalar_lea.hbm %s3024_s2, %s2609_s12  ;;  %s437_s9 = scalar_lea.vmem [#allocation8], %s2606_s27 }
  0xe2   : > { %s444_s11 = sshll.u32 %s437_s9, 4  ;;  %s2186_s29 = scalar_lea.hbm %s2767_s24, 512  ;;  %s2770_s11 = int_to_ptr.vmem [resolvable:$true] %s444_s11 }
  0xe3   : > { %p2187_p13 = scmp.ne.s32.totalorder %s2767_s24, %s2186_s29  ;;  %p3093_p3 = scmp.ne.s32.totalorder %s3084_s13, 0 }
  0xe4   : > { %s2191_s28 = scalar_lea.hbm %s3024_s2, 2048  ;;  %p2192_p12 = scmp.lt.u32.totalorder %s2767_s24, %s3024_s2 }
  0xe5   : > { %p2189_p1 = pnand %p2187_p13, %p3093_p3  ;;  %p2193_p4 = scmp.lt.u32.totalorder %s2191_s28, %s2186_s29 }
  0xe6   : > { %p2195_p11 = scmp.lt.u32.totalorder %s2186_s29, %s2767_s24 }
  0xe7   : > { %p2190_p8 = pneg %p2189_p1  ;;  %p2194_p5 = por %p2193_p4, %p2192_p12 }
  0xe9   : > { %p2196_p0 = por %p2195_p11, %p2194_p5 }
  0xeb   : > { %p2197_p7 = pnand %p2196_p0, %p2190_p8 }
  0xed   : > { %2200 = shalt.err (!%p2197_p7)
}
  0xee   : > { %s2201_s27 = scalar_lea.vmem %s2770_s11, 512  ;;  %s2421_s1 = smov [#allocation8]  }
  0xef   : > { %p2202_p9 = scmp.ne.s32.totalorder %s2770_s11, %s2201_s27  ;;  %s2206_s15 = sshll.u32 %s2421_s1, 4  ;;  %s2207_s15 = int_to_ptr.vmem [resolvable:$false] %s2206_s15 }
  0xf0   : > { %s2208_s18 = scalar_lea.vmem %s2207_s15, 1024  ;;  %p2209_p6 = scmp.lt.s32.totalorder %s2770_s11, %s2207_s15 }
  0xf1   : > { %p2204_p2 = pnand %p2202_p9, %p3093_p3  ;;  %p2210_p13 = scmp.lt.s32.totalorder %s2208_s18, %s2201_s27 }
  0xf3   : > { %p2205_p10 = pneg %p2204_p2  ;;  %p2211_p1 = por %p2210_p13, %p2209_p6 }
  0xf5   : > { %p2212_p12 = pnand %p2211_p1, %p2205_p10 }
  0xf7   : > { %2215 = shalt.err (!%p2212_p12)
}
  0xf8   : > { %p3094_p8 = scmp.ne.s32.totalorder %s3075_s30, 0  ;;  %s3095_s22 = scalar_lea.sflag [#allocation7], %s2596_s17 }
  0xf9   : > { %s2802_s29 = scalar_lea.hbm %s3026_s4, %s2668_s19  ;;  %s478_s3 = scalar_lea.vmem [#allocation11], %s2601_s20 }
  0xfa   : > { %1886 = dma.hbm_to_vmem [thread:$0]  (!%p3094_p8), %s2767_s24, 512, %s2770_s11, %s3095_s22, %s3092_s16, %s3092_s16, %s3091_s8  }
  0xfb   : > { %s485_s23 = sshll.u32 %s478_s3, 4  ;;  %s2216_s28 = scalar_lea.hbm %s2802_s29, 16  ;;  %s486_s23 = int_to_ptr.vmem [resolvable:$true] %s485_s23 }
  0xfc   : > { %p2217_p4 = scmp.ne.s32.totalorder %s2802_s29, %s2216_s28  ;;  %s2221_s8 = scalar_lea.hbm %s3026_s4, 64 }
  0xfd   : > { %p2222_p0 = scmp.lt.u32.totalorder %s2802_s29, %s3026_s4  ;;  %p2223_p7 = scmp.lt.u32.totalorder %s2221_s8, %s2216_s28 }
  0xfe   : > { %p2219_p5 = pnand %p2217_p4, %p3093_p3  ;;  %p2225_p2 = scmp.lt.u32.totalorder %s2216_s28, %s2802_s29 }
  0xff   : > { %p2224_p9 = por %p2223_p7, %p2222_p0 }
 0x100   : > { %p2220_p11 = pneg %p2219_p5 }
 0x101   : > { %p2226_p10 = por %p2225_p2, %p2224_p9 }
 0x103   : > { %p2227_p6 = pnand %p2226_p10, %p2220_p11 }
 0x105   : > { %2230 = shalt.err (!%p2227_p6)
}
 0x106   : > { %s2231_s11 = scalar_lea.vmem %s486_s23, 16  ;;  %s2422_s27 = smov [#allocation11]  }
 0x107   : > { %p2232_p13 = scmp.ne.s32.totalorder %s486_s23, %s2231_s11  ;;  %s2236_s1 = sshll.u32 %s2422_s27, 4  ;;  %s2237_s1 = int_to_ptr.vmem [resolvable:$false] %s2236_s1 }
 0x108   : > { %s2238_s15 = scalar_lea.vmem %s2237_s1, 32  ;;  %p2239_p4 = scmp.lt.s32.totalorder %s486_s23, %s2237_s1 }
 0x109   : > { %p2234_p1 = pnand %p2232_p13, %p3093_p3  ;;  %p2240_p5 = scmp.lt.s32.totalorder %s2238_s15, %s2231_s11 }
 0x10b   : > { %p2235_p12 = pneg %p2234_p1  ;;  %p2241_p8 = por %p2240_p5, %p2239_p4 }
 0x10d   : > { %p2242_p0 = pnand %p2241_p8, %p2235_p12 }
 0x10f   : > { %2245 = shalt.err (!%p2242_p0)
}
 0x110   : > { %p3096_p7 = scmp.ne.s32.totalorder %s3075_s30, 0  ;;  %s3097_s18 = scalar_lea.sflag [#allocation10], %s2596_s17 }
 0x111   : > { %s2828_s9 = scalar_lea.hbm %s3028_s6, %s2668_s19  ;;  %s512_s3 = scalar_lea.vmem [#allocation14], %s2601_s20 }
 0x112   : > { %1892 = dma.hbm_to_vmem [thread:$0]  (!%p3096_p7), %s2802_s29, 16, %s486_s23, %s3097_s18  }
 0x113   : > { %s519_s28 = sshll.u32 %s512_s3, 4  ;;  %s2246_s5 = scalar_lea.hbm %s2828_s9, 16  ;;  %s520_s28 = int_to_ptr.vmem [resolvable:$true] %s519_s28 }
 0x114   : > { %p2247_p8 = scmp.ne.s32.totalorder %s2828_s9, %s2246_s5  ;;  %s2251_s29 = scalar_lea.hbm %s3028_s6, 64 }
 0x115   : > { %p2252_p2 = scmp.lt.u32.totalorder %s2828_s9, %s3028_s6  ;;  %p2253_p10 = scmp.lt.u32.totalorder %s2251_s29, %s2246_s5 }
 0x116   : > { %p2249_p11 = pnand %p2247_p8, %p3093_p3  ;;  %p2255_p13 = scmp.lt.u32.totalorder %s2246_s5, %s2828_s9 }
 0x117   : > { %p2254_p6 = por %p2253_p10, %p2252_p2 }
 0x118   : > { %p2250_p9 = pneg %p2249_p11 }
 0x119   : > { %p2256_p1 = por %p2255_p13, %p2254_p6 }
 0x11b   : > { %p2257_p12 = pnand %p2256_p1, %p2250_p9 }
 0x11d   : > { %2260 = shalt.err (!%p2257_p12)
}
 0x11e   : > { %s2261_s19 = scalar_lea.vmem %s520_s28, 16  ;;  %s2423_s24 = smov [#allocation14]  }
 0x11f   : > { %p2262_p4 = scmp.ne.s32.totalorder %s520_s28, %s2261_s19  ;;  %s2266_s11 = sshll.u32 %s2423_s24, 4  ;;  %s2267_s11 = int_to_ptr.vmem [resolvable:$false] %s2266_s11 }
 0x120   : > { %s2268_s27 = scalar_lea.vmem %s2267_s11, 32  ;;  %p2269_p8 = scmp.lt.s32.totalorder %s520_s28, %s2267_s11 }
 0x121   : > { %p2264_p5 = pnand %p2262_p4, %p3093_p3  ;;  %p2270_p11 = scmp.lt.s32.totalorder %s2268_s27, %s2261_s19 }
 0x123   : > { %p2265_p0 = pneg %p2264_p5  ;;  %p2271_p7 = por %p2270_p11, %p2269_p8 }
 0x125   : > { %p2272_p2 = pnand %p2271_p7, %p2265_p0 }
 0x127   : > { %2275 = shalt.err (!%p2272_p2)
}
 0x128   : > { %p3098_p10 = scmp.ne.s32.totalorder %s3075_s30, 0  ;;  %s1682_s1 = sshll.u32 %s2601_s20, 3 }
 0x129   : > { %s1683_s15 = sshll.u32 %s2406_s21, 7  ;;  %s530_s3 = scalar_lea.vmem [#allocation15], %s1682_s1 }
 0x12a   : > { %1898 = dma.hbm_to_vmem [thread:$0]  (!%p3098_p10), %s2828_s9, 16, %s520_s28, %s493_s14  }
 0x12b   : > { %s2855_s25 = scalar_lea.hbm %s3029_s7, %s1683_s15  ;;  %s537_s5 = sshll.u32 %s530_s3, 4  ;;  %s538_s5 = int_to_ptr.vmem [resolvable:$true] %s537_s5 }
 0x12c   : > { %s527_s12 = scalar_lea.sflag [#allocation16], %s2596_s17  ;;  %s2276_s8 = scalar_lea.hbm %s2855_s25, 128 }
 0x12d   : > { %p2277_p7 = scmp.ne.s32.totalorder %s2855_s25, %s2276_s8  ;;  %s2281_s9 = scalar_lea.hbm %s3029_s7, 512 }
 0x12e   : > { %p2282_p13 = scmp.lt.u32.totalorder %s2855_s25, %s3029_s7  ;;  %p2283_p1 = scmp.lt.u32.totalorder %s2281_s9, %s2276_s8 }
 0x12f   : > { %p2279_p9 = pnand %p2277_p7, %p3093_p3  ;;  %p2285_p4 = scmp.lt.u32.totalorder %s2276_s8, %s2855_s25 }
 0x130   : > { %p2284_p12 = por %p2283_p1, %p2282_p13 }
 0x131   : > { %p2280_p6 = pneg %p2279_p9 }
 0x132   : > { %p2286_p5 = por %p2285_p4, %p2284_p12 }
 0x134   : > { %p2287_p0 = pnand %p2286_p5, %p2280_p6 }
 0x136   : > { %2290 = shalt.err (!%p2287_p0)
}
 0x137   : > { %s2291_s17 = scalar_lea.vmem %s538_s5, 128  ;;  %s2424_s23 = smov [#allocation15]  }
 0x138   : > { %p2292_p8 = scmp.ne.s32.totalorder %s538_s5, %s2291_s17  ;;  %s2296_s16 = sshll.u32 %s2424_s23, 4  ;;  %s2297_s16 = int_to_ptr.vmem [resolvable:$false] %s2296_s16 }
 0x139   : > { %s2298_s19 = scalar_lea.vmem %s2297_s16, 256  ;;  %p2299_p7 = scmp.lt.s32.totalorder %s538_s5, %s2297_s16 }
 0x13a   : > { %p2294_p11 = pnand %p2292_p8, %p3093_p3  ;;  %p2300_p9 = scmp.lt.s32.totalorder %s2298_s19, %s2291_s17 }
 0x13c   : > { %p2295_p2 = pneg %p2294_p11  ;;  %p2301_p10 = por %p2300_p9, %p2299_p7 }
 0x13e   : > { %p2302_p1 = pnand %p2301_p10, %p2295_p2 }
 0x140   : > { %2305 = shalt.err (!%p2302_p1)
}
 0x141   : > { %p3099_p13 = scmp.ne.s32.totalorder %s3075_s30, 0  ;;  %p3100_p6 = scmp.ne.s32.totalorder %s3073_s26, 0 }
 0x142   : > { %s3101_s24 = sld [smem:[#allocation34_spill]] (!%p3100_p6) }
 0x143   : > { %1901 = dma.hbm_to_vmem [thread:$0]  (!%p3099_p13), %s2855_s25, 128, %s538_s5, %s527_s12  }
 0x144   : > { %546 = sbr.rel (%p3100_p6) target bundleno = 1909 (0x775), region = 64 }
 0x148   : > { %p3102_p12 = scmp.eq.s32.totalorder (!%p3100_p6), %s3101_s24, 0 }
 0x14b   : > { %2357 = dma.done.wait (%p3102_p12), [#allocation4], 256   ;;  %p3103_p3 = pmov %p3102_p12 }
 0x14c   : > { %s3104_s13 = sld [smem:[#allocation30_spill]]  ;;  %s3105_s11 = sld [smem:[#allocation35_spill]] }
 0x14d   : > { %2359 = vsyncadd (%p3103_p3), [#allocation4], 4294967040  ;;  %s552_s27 = sand.u32 1, %s3101_s24  }
 0x14e   : > { %s553_s30 = scalar_lea.sflag [#allocation7], %s552_s27 }
 0x152   : > { %s2883_s1 = sand.u32 1, %s3104_s13   ;;  %p3106_p10 = scmp.ne.s32.totalorder %s3105_s11, 0 }
 0x153   : > { %s1686_s15 = sshll.u32 %s2883_s1, 5 }
 0x154   : > { %s2886_s18 = scalar_lea.vmem [#allocation6], %s1686_s15 }
 0x155   : > { %2361 = dma.done.wait (%p3106_p10), %s553_s30, 1024  }
 0x156   : > { %2363 = vsyncadd (%p3106_p10), %s553_s30, 4294966272  ;;  %s565_s26 = scalar_lea.vmem [#allocation8], %s1686_s15  ;;  %s571_s22 = scalar_lea.sflag [#allocation10], %s552_s27 }
 0x157   : > { %s2892_s25 = scalar_lea.vmem [#allocation9], %s1686_s15 }
 0x158   : > { %2365 = dma.done.wait (%p3106_p10), %s571_s22, 528  }
 0x159   : > { %2367 = vsyncadd (%p3106_p10), %s571_s22, 4294966768  ;;  %s582_s3 = scalar_lea.vmem [#allocation11], %s2883_s1  ;;  %s588_s5 = scalar_lea.sflag [#allocation13], %s552_s27 }
 0x15a   : > { %s590_s12 = scalar_lea.vmem [#allocation12], %s2883_s1 }
 0x15b   : > { %2369 = dma.done.wait (%p3106_p10), %s588_s5, 32  }
 0x15c   : > { %2371 = vsyncadd (%p3106_p10), %s588_s5, 4294967264  ;;  %s1689_s8 = sshll.u32 %s2883_s1, 3  ;;  %s598_s20 = scalar_lea.vmem [#allocation14], %s2883_s1 }
 0x15d   : > { %s604_s14 = scalar_lea.sflag [#allocation16], %s552_s27  ;;  %s2906_s9 = scalar_lea.vmem [#allocation15], %s1689_s8 }
 0x15e   : > { %2373 = dma.done.wait (%p3106_p10), %s604_s14, 128  }
 0x15f   : > { %2375 = vsyncadd (%p3106_p10), %s604_s14, 4294967168  ;;  %p3107_p4 = pmov %p3103_p3 }
 0x160   : > { %p3108_p5 = pmov %p3103_p3 }
 0x161   : > { %2377 = dma.done.wait (%p3107_p4), [#allocation16], 16  }
 0x162   : > { %2379 = vsyncadd (%p3108_p5), [#allocation16], 4294967280  ;;  %p3109_p0 = pmov %p3103_p3 }
 0x164   : > { %2381 = dma.done.wait (%p3109_p0), [#allocation19], 32   ;;  %p3110_p8 = pmov %p3109_p0 }
 0x165   : > { %v777_v0 = vld [vmem:[%s565_s26] sm:$0xff]  ;;  %v778_v1 = vld [vmem:[%s565_s26 + $0x8] sm:$0xff]  ;;  %vm695_vm0 = vcmask 261120   ;;  %v779_v5 = vld [vmem:[%s565_s26 + $0x10] sm:$0xff]  ;;  %v2425_v14 = vmov 0.0   ;;  %vm2426_vm1 = vmmov 0  }
 0x166   : > { %2383 = vsyncadd (%p3110_p8), [#allocation19], 4294967264  ;;  %v684_v2 = vld [vmem:[%s2886_s18] sm:$0xff]  ;;  %v1817_v3 = vpack.c.bf16 %v778_v1, %v777_v0  ;;  %v685_v4 = vld [vmem:[%s2886_s18 + $0x8] sm:$0xff]  ;;  %vm951_vm2 = vcmask 64512   ;;  %s3111_s28 = sld [smem:[#allocation32_spill]] }
 0x167   : > { %v780_v6 = vld [vmem:[%s565_s26 + $0x18] sm:$0xff]  ;;  %v1809_v7 = vpack.c.bf16 %v685_v4, %v684_v2  ;;  %v686_v9 = vld [vmem:[%s2886_s18 + $0x10] sm:$0xff]  ;;  %v1696_v15 = vld [vmem:[%s590_s12] ss:$0 sm:$0xff] }
 0x168   : > { %v1821_v8 = vpack.c.bf16 %v780_v6, %v779_v5  ;;  %v687_v10 = vld [vmem:[%s2886_s18 + $0x18] sm:$0xff]  ;;  %v2924_v11 = vld [vmem:[#allocation3] sm:$0xff]  ;;  %1818 = vmatprep.subr.bf16.mxu1 %v1817_v3  ;;  %v1693_v17 = vld [vmem:[%s582_s3] ss:$0 sm:$0xff] }
 0x169   : > { %v1813_v12 = vpack.c.bf16 %v687_v10, %v686_v9  ;;  %1770 = vmatprep.mubr.msk.f32.mxu1 %vm695_vm0, %v2924_v11  ;;  %1810 = vmatprep.subr.bf16.mxu0 %v1809_v7  ;;  %v2930_v13 = vld [vmem:[#allocation3 + $0x8] sm:$0xff]  ;;  %v863_v27 = vld [vmem:[%s2892_s25] sm:$0xff]  ;;  %v864_v28 = vld [vmem:[%s2892_s25 + $0x8] sm:$0xff] }
 0x16a   : > { %1820 = vmatpush3.bf16.msra.mxu1 %v1817_v3  ;;  %1812 = vmatpush3.bf16.msra.mxu0 %v1809_v7  ;;  %v865_v29 = vld [vmem:[%s2892_s25 + $0x10] sm:$0xff]  ;;  %v1825_v30 = vpack.c.bf16 %v864_v28, %v863_v27  ;;  %v866_v31 = vld [vmem:[%s2892_s25 + $0x18] sm:$0xff]  ;;  %v1699_v50 = vld [vmem:[%s598_s20] ss:$0 sm:$0xff] }
 0x16b   : > { %1822 = vmatprep.subr.bf16.mxu1 %v1821_v8  ;;  %1814 = vmatprep.subr.bf16.mxu0 %v1813_v12  ;;  %v1829_v32 = vpack.c.bf16 %v866_v31, %v865_v29 }
 0x16c   : > { %1759 = vmatprep.mubr.msk.f32.mxu0 %vm695_vm0, %v2924_v11  ;;  %p1708_p11 = scmp.ne.s32.totalorder %s3111_s28, 0 }
 0x16d   : > { %v1709_v0 = vld [vmem:[#allocation17] ss:$0 sm:$0xff] (!%p1708_p11) }
 0x16e   : > { %1824 = vmatpush3.bf16.msra.mxu1 %v1821_v8  ;;  %1816 = vmatpush3.bf16.msra.mxu0 %v1813_v12  ;;  %v1283_v1 = vadd.f32 (!%p1708_p11), %v1709_v0, %v2924_v11  ;;  %v1284_v2 = vadd.f32 (!%p1708_p11), %v1709_v0, %v2930_v13 }
 0x16f   : > { %1784 = vmatprep.subr.mxu1 %v2425_v14  ;;  %1826 = vmatprep.subr.bf16.mxu0 %v1825_v30 }
 0x170   : > { %1285 = vst.msk [vmem:[#allocation2] sm:$0xff] (!%p1708_p11), %vm695_vm0, %v1283_v1  ;;  %1286 = vst.msk [vmem:[#allocation2 + $0x8] sm:$0xff] (!%p1708_p11), %vm695_vm0, %v1284_v2 }
 0x171   : > { %1771 = vmatmul.mubr.msk.f32.vlgmr.msra.gmra.mrb[0].mxu1 %vm695_vm0, %v2930_v13  ;;  %1760 = vmatmul.mubr.msk.f32.vlgmr.msra.gmra.mrb[0].mxu0 %vm695_vm0, %v2930_v13 }
 0x172   : > { %1781 = vmatprep.mubr.msk.f32.mxu0 %vm695_vm0, %v2924_v11  ;;  %1786 = vmatprep.mubr.msk.f32.mxu1 %vm2426_vm1, %v2425_v14 }
 0x173   : > { %1828 = vmatpush3.bf16.msra.mxu0 %v1825_v30 }
 0x174   : > { %1830 = vmatprep.subr.bf16.mxu0 %v1829_v32 }
 0x177   : > { %1832 = vmatpush3.bf16.msra.mxu0 %v1829_v32 }
 0x178   : > { %1794 = vmatprep.subr.mxu0 %v2425_v14 }
 0x17a   : > { %1782 = vmatmul.mubr.msk.f32.vlgmr.msra.gmra.mrb[2].mxu0 %vm695_vm0, %v2930_v13 }
 0x17b   : > { %1796 = vmatprep.mubr.msk.f32.mxu0 %vm2426_vm1, %v2425_v14 }
 0x244   : > { %v1772_v16 = vpop.f32.mrb[0].mxu1  ;;  %v1761_v18 = vpop.f32.mrb[0].mxu0 }
 0x245   : > { %v854_v19 = vpop.f32.mrb[1].mxu1  ;;  %v768_v21 = vpop.f32.mrb[1].mxu0  ;;  %v774_v23 = vadd.f32 %v1761_v18, %v1693_v17  ;;  %v860_v25 = vadd.f32 %v1772_v16, %v1696_v15 }
 0x246   : > { %v855_v20 = vadd.f32 %v1696_v15, %v854_v19  ;;  %v769_v22 = vadd.f32 %v1693_v17, %v768_v21 }
 0x247   : > { %v950_v26 = vmul.f32 0.35355338, %v774_v23 }
 0x248   : > { %1785 = vmatpush3.xpose.msk.msra.mxu1 %vm951_vm2, %v855_v20  ;;  %v949_v24 = vmul.f32 0.35355338, %v769_v22 }
 0x249   : > { %1789 = vmatprep.subr.mxu1 %v2425_v14 }
 0x24b   : > { %1787 = vmatmul.mubr.msk.f32.vlgmr.msra.gmra.mrb[2].mxu1 %vm951_vm2, %v949_v24 }
 0x24c   : > { %1790 = vmatpush3.xpose.msk.msra.mxu1 %vm951_vm2, %v860_v25  ;;  %1791 = vmatprep.mubr.msk.f32.mxu1 %vm2426_vm1, %v2425_v14 }
 0x24d   : > { %1799 = vmatprep.subr.mxu1 %v2425_v14  ;;  %v1783_v49 = vpop.f32.mrb[2].mxu0 }
 0x24e   : > { %v940_v51 = vpop.f32.mrb[3].mxu0  ;;  %v946_v53 = vadd.f32 %v1783_v49, %v1699_v50 }
 0x24f   : > { %1792 = vmatmul.mubr.msk.f32.vlgmr.msra.gmra.mrb[4].mxu1 %vm951_vm2, %v950_v26  ;;  %v941_v52 = vadd.f32 %v1699_v50, %v940_v51 }
 0x250   : > { %1801 = vmatprep.mubr.msk.f32.mxu1 %vm2426_vm1, %v2425_v14  ;;  %1800 = vmatpush3.msra.mxu1 %v946_v53 }
 0x251   : > { %1795 = vmatpush3.msra.mxu0 %v941_v52 }
 0x31e   : > { %v1024_v33 = vpop.f32.mrb[2].mxu1 }
 0x31f   : > { %v1788_v34 = vpop.f32.mrb[3].mxu1  ;;  %v1104_v35 = vsel %vm951_vm2, %v1024_v33, -inf }
 0x320   : > { %1105 = vmax.xlane.f32.xlu0 %v1104_v35 }
 0x322   : > { %v1100_v36 = vpop.f32.mrb[4].mxu1 }
 0x323   : > { %v1793_v37 = vpop.f32.mrb[5].mxu1  ;;  %v1107_v38 = vsel %vm951_vm2, %v1100_v36, -inf }
 0x324   : > { %1108 = vmax.xlane.f32.xlu0 %v1107_v38 }
 0x3ad   : > { %v1106_v39 = vpop.xlane.xlu0 %1105 }
 0x3ae   : > { %v1110_v40 = vsub.f32 %v1024_v33, %v1106_v39 }
 0x3b0   : > { %v1112_v41 = vmul.f32 1.442695, %v1110_v40 }
 0x3b1   : > { %v1109_v42 = vpop.xlane.xlu0 %1108 }
 0x3b2   : > { %1972 = vpow2.f32 %v1112_v41  ;;  %v1111_v43 = vsub.f32 %v1100_v36, %v1109_v42 }
 0x3b4   : > { %v1114_v44 = vmul.f32 1.442695, %v1111_v43 }
 0x3b6   : > { %1974 = vpow2.f32 %v1114_v44 }
 0x3bc   : > { %v1973_v45 = vpop.eup %1972 }
 0x3bd   : > { %v1116_v46 = vsel %vm951_vm2, %v1973_v45, 0.0 }
 0x3be   : > { %1117 = vadd.xlane.f32.xlu1 %v1116_v46 }
 0x3c0   : > { %v1975_v47 = vpop.eup %1974 }
 0x3c1   : > { %v1119_v48 = vsel %vm951_vm2, %v1975_v47, 0.0 }
 0x3c2   : > { %1120 = vadd.xlane.f32.xlu1 %v1119_v48 }
 0x44b   : > { %v1118_v54 = vpop.xlane.xlu1 %1117 }
 0x44c   : > { %1976 = vrcp.f32 %v1118_v54 }
 0x44f   : > { %v1121_v55 = vpop.xlane.xlu1 %1120 }
 0x450   : > { %1978 = vrcp.f32 %v1121_v55 }
 0x456   : > { %v1977_v56 = vpop.eup %1976 }
 0x457   : > { %v1124_v57 = vmul.f32 %v1977_v56, %v1973_v45 }
 0x459   : > { %1797 = vmatmul.mubr.msk.f32.vlgmr.msra.gmra.mrb[4].mxu0 %vm951_vm2, %v1124_v57 }
 0x45a   : > { %v1979_v58 = vpop.eup %1978 }
 0x45b   : > { %v1125_v59 = vmul.f32 %v1979_v58, %v1975_v47 }
 0x45d   : > { %1802 = vmatmul.mubr.msk.f32.vlgmr.msra.gmra.mrb[6].mxu1 %vm951_vm2, %v1125_v59 }
 0x52b   : > { %1275 = sbr.rel (%p1708_p11) target bundleno = 1330 (0x532), region = 112 }
 0x52c   : > { %v1195_v60 = vpop.f32.mrb[4].mxu0 }
 0x52d   : > { %v1798_v61 = vpop.f32.mrb[5].mxu0 }
 0x530   : > { %v1268_v62 = vpop.f32.mrb[6].mxu1 }
 0x531   : > { %v1803_v63 = vpop.f32.mrb[7].mxu1 }
 0x532 PF: > { %v1289_v3 = vld [vmem:[%s2906_s9] sm:$0xff]  ;;  %1806 = vmatprep.mubr.msk.f32.mxu0 %vm951_vm2, %v1195_v60  ;;  %s3112_s29 = sld [smem:[#allocation32_spill]] }
 0x533   : > { %1804 = vmatprep.subr.mxu0 %v1289_v3  ;;  %v1288_v4 = vld [vmem:[#allocation2 + $0x8] sm:$0xff]  ;;  %v1287_v5 = vld [vmem:[#allocation2] sm:$0xff] }
 0x534   : > { %1805 = vmatpush3.msra.mxu0 %v1289_v3 }
 0x535   : > { %1807 = vmatmul.mubr.msk.f32.vlgmr.msra.gmra.mrb[6].mxu0 %vm951_vm2, %v1268_v62 }
 0x538   : > { %p1712_p2 = scmp.ne.s32.totalorder %s3112_s29, 3 }
 0x539   : > { %v1713_v31 = vld [vmem:[#allocation18] ss:$0 sm:$0xff] (!%p1712_p2)  ;;  %v1714_v33 = vld [vmem:[#allocation20] ss:$0 sm:$0xff] (!%p1712_p2) }
 0x606   : > { %1378 = sbr.rel (%p1712_p2) target bundleno = 1874 (0x752), region = 116 }
 0x608   : > { %v1808_v6 = vpop.f32.mrb[6].mxu0 }
 0x609   : > { %v1372_v7 = vadd.f32 %v1808_v6, %v1288_v4  ;;  %v1362_v8 = vpop.f32.mrb[7].mxu0 }
 0x60a   : > { %v1371_v9 = vadd.f32 %v1362_v8, %v1287_v5 }
 0x60b   : > { %1374 = vst.msk [vmem:[#allocation2 + $0x8] sm:$0xff] %vm695_vm0, %v1372_v7 }
 0x60c   : > { %1373 = vst.msk [vmem:[#allocation2] sm:$0xff] %vm695_vm0, %v1371_v9 }
 0x612   : > { %v1380_v11 = vld [vmem:[#allocation2 + $0x8] sm:$0xff] }
 0x613   : > { %v1379_v10 = vld [vmem:[#allocation2] sm:$0xff]  ;;  %v1384_v13 = vsel %vm695_vm0, %v1380_v11, 0.0 }
 0x614   : > { %v1381_v12 = vsel %vm695_vm0, %v1379_v10, 0.0 }
 0x615   : > { %1382 = vadd.xlane.f32.xlu0 %v1381_v12 }
 0x619   : > { %1385 = vadd.xlane.f32.xlu0 %v1384_v13 }
 0x6a2   : > { %v1383_v14 = vpop.xlane.xlu0 %1382 }
 0x6a3   : > { %v1388_v15 = vmul.f32 0.03125, %v1383_v14 }
 0x6a5   : > { %v1390_v16 = vsub.f32 %v1379_v10, %v1388_v15 }
 0x6a6   : > { %v1386_v17 = vpop.xlane.xlu0 %1385 }
 0x6a7   : > { %v1389_v18 = vmul.f32 0.03125, %v1386_v17  ;;  %v1392_v19 = vmul.f32 %v1390_v16, %v1390_v16 }
 0x6a9   : > { %v1391_v20 = vsub.f32 %v1380_v11, %v1389_v18  ;;  %v1394_v21 = vsel %vm695_vm0, %v1392_v19, 0.0 }
 0x6aa   : > { %1395 = vadd.xlane.f32.xlu1 %v1394_v21 }
 0x6ab   : > { %v1393_v22 = vmul.f32 %v1391_v20, %v1391_v20 }
 0x6ad   : > { %v1397_v23 = vsel %vm695_vm0, %v1393_v22, 0.0 }
 0x6ae   : > { %1398 = vadd.xlane.f32.xlu1 %v1397_v23 }
 0x737   : > { %v1396_v24 = vpop.xlane.xlu1 %1395 }
 0x738   : > { %v1400_v25 = vmul.f32 0.03125, %v1396_v24 }
 0x73a   : > { %v1402_v26 = vadd.f32 1e-05, %v1400_v25 }
 0x73b   : > { %v1399_v27 = vpop.xlane.xlu1 %1398 }
 0x73c   : > { %1980 = vrsqrt.f32 %v1402_v26  ;;  %v1401_v28 = vmul.f32 0.03125, %v1399_v27 }
 0x73e   : > { %v1403_v29 = vadd.f32 1e-05, %v1401_v28 }
 0x740   : > { %1982 = vrsqrt.f32 %v1403_v29 }
 0x746   : > { %v1981_v30 = vpop.eup %1980 }
 0x747   : > { %v1406_v32 = vmul.f32 %v1981_v30, %v1390_v16 }
 0x749   : > { %v1415_v34 = vmul.f32 %v1713_v31, %v1406_v32 }
 0x74a   : > { %v1983_v35 = vpop.eup %1982 }
 0x74b   : > { %v1424_v36 = vadd.f32 %v1714_v33, %v1415_v34  ;;  %v1407_v37 = vmul.f32 %v1983_v35, %v1391_v20 }
 0x74d   : > { %1426 = vst.msk [vmem:[#allocation21] sm:$0xff] %vm695_vm0, %v1424_v36  ;;  %v1416_v38 = vmul.f32 %v1713_v31, %v1407_v37 }
 0x74f   : > { %v1425_v39 = vadd.f32 %v1714_v33, %v1416_v38 }
 0x751   : > { %1427 = vst.msk [vmem:[#allocation21 + $0x8] sm:$0xff] %vm695_vm0, %v1425_v39 }
 0x752 PF: > { %s3113_s17 = sld [smem:[#allocation34_spill]]  ;;  %s2427_s23 = smov [#allocation21]  }
 0x753   : > { %s1437_s16 = sshll.u32 %s2427_s23, 4  ;;  %s1438_s16 = int_to_ptr.vmem [resolvable:$true] %s1437_s16 }
 0x754   : > { %s2306_s19 = scalar_lea.vmem %s1438_s16, 256  ;;  %p2313_p6 = scmp.lt.s32.totalorder %s1438_s16, %s1438_s16 }
 0x755   : > { %p2307_p9 = scmp.ne.s32.totalorder %s1438_s16, %s2306_s19  ;;  %p2314_p12 = scmp.lt.s32.totalorder %s2306_s19, %s2306_s19 }
 0x757   : > { %p2315_p3 = por %p2314_p12, %p2313_p6 }
 0x758   : > { %p1911_p7 = scmp.eq.s32.totalorder %s3113_s17, 3 }
 0x75a   : > { %p2308_p1 = pnand %p2307_p9, %p1911_p7 }
 0x75c   : > { %p2309_p13 = pneg %p2308_p1 }
 0x75e   : > { %p2316_p10 = pnand %p2315_p3, %p2309_p13 }
 0x760   : > { %2319 = shalt.err (!%p2316_p10)
}
 0x761   : > { %s3114_s11 = sld [smem:[#allocation43_spill]] }
 0x767   : > { %s2320_s27 = scalar_lea.hbm %s3114_s11, 256 }
 0x768   : > { %p2321_p4 = scmp.ne.s32.totalorder %s3114_s11, %s2320_s27  ;;  %p2326_p8 = scmp.lt.u32.totalorder %s2320_s27, %s3114_s11 }
 0x76a   : > { %p2322_p5 = pnand %p2321_p4, %p1911_p7 }
 0x76c   : > { %p2323_p0 = pneg %p2322_p5 }
 0x76e   : > { %p2328_p11 = pnand %p2326_p8, %p2323_p0 }
 0x770   : > { %2331 = shalt.err (!%p2328_p11)
}
 0x771   : > { %s2428_s26 = smov 128   ;;  %s2429_s22 = smov 8  }
 0x772   : > { %1864 = dma.vmem_to_hbm [thread:$0]  (%p1911_p7), %s1438_s16, 256, %s3114_s11, [#allocation5], %s2428_s26, %s2428_s26, %s2429_s22  }
 0x773   : > { %2385 = dma.done.wait (%p1911_p7), [#allocation5], 256  }
 0x774   : > { %2387 = vsyncadd (%p1911_p7), [#allocation5], 4294967040 }
 0x775 PF: > { %s3115_s5 = sld [smem:[#allocation33_spill]]  ;;  %s3116_s17 = sld [smem:[#allocation30_spill]] }
 0x776   : > { %s3117_s18 = sld [smem:[#allocation31_spill]]  ;;  %s3118_s19 = sld [smem:[#allocation37_spill]] }
 0x777   : > { %s3119_s12 = sld [smem:[#allocation36_spill]]  ;;  %s3120_s20 = smov %s2406_s21 }
 0x77b   : > { %s36_s22 = sadd.s32 1, %s3115_s5  }
 0x77c   : > { %p33_p2 = scmp.ge.s32.totalorder %s36_s22, 6  }
 0x77d   : > { %s3121_s21 = smov %s3119_s12 }
 0x77e   :  { %35 = sbr.rel (!%p33_p2) target bundleno = 20 (0x14), region = 200 }
 0x785   :  { %1453 = vsyncpa [#allocation4], 1 }
 0x786   :  { %1455 = vsyncpa [#allocation4 + $0x1], 1 }
 0x787   :  { %1456 = vsyncpa [#allocation7], 1 }
 0x788   :  { %1458 = vsyncpa [#allocation7 + $0x1], 1 }
 0x789   :  { %1459 = vsyncpa [#allocation10], 1 }
 0x78a   :  { %1461 = vsyncpa [#allocation10 + $0x1], 1 }
 0x78b   :  { %1462 = vsyncpa [#allocation13], 1 }
 0x78c   :  { %1464 = vsyncpa [#allocation13 + $0x1], 1 }
 0x78d   :  { %1465 = vsyncpa [#allocation16], 1 }
 0x78e   :  { %1467 = vsyncpa [#allocation16 + $0x1], 1 }
 0x78f   :  { %1468 = vsyncpa [#allocation19], 1 }
 0x790   :  { %1469 = vsyncpa [#allocation5], 1 }
 0x791   :  { %1471 = vsyncpa [#allocation5 + $0x1], 1 }

</bundles_post_ra>
